<compile_context>
chip_gen: v5e
topology: v5e:2x2
jax: 0.10.0
libtpu: 0.0.40
codegen_flags: <defaults>
</compile_context>

<pallas_src>
import jax
import jax.numpy as jnp
from jax.experimental import pallas as pl
from jax.experimental.pallas import tpu as pltpu

NEG_SLOPE = 0.2   # PyG GATConv default LeakyReLU negative_slope
LANE = 128        # TPU lane width
NEG_INF = -1e30   # finite f32 "minus infinity" for masking (kept in f32)


def _round_up(x, m):
    return (x + m - 1) // m * m


def _pad_to(a, shape):
    return jnp.pad(a, [(0, t - s) for s, t in zip(a.shape, shape)])


def _gat_conv(x, w_bf16, a_src, a_dst, b, adj_bias):
    """One GATConv (heads=1) on VMEM-resident values.

    MXU operands are bf16 with f32 accumulation; attention / softmax math f32.
    """
    # h = x @ W  -> [N, F_pad]
    h = jnp.dot(x.astype(jnp.bfloat16), w_bf16,
                preferred_element_type=jnp.float32)
    # Per-node attention logits (PyG splits the attention vector a into
    # att_src / att_dst).  dst logits: VPU mul + XLU lane-reduce -> [N, 1].
    alpha_dst = jnp.sum(h * a_dst, axis=-1, keepdims=True)            # [N, 1]
    # [1, N] source-logit row via a tiny trans_b matmul: avoids an [N, N]
    # rank-1 outer product and any in-kernel transpose.
    alpha_src_row = jax.lax.dot_general(
        a_src, h, (((1,), (1,)), ((), ())),
        preferred_element_type=jnp.float32)                           # [1, N]
    # e[i, j] = LeakyReLU(alpha_dst[i] + alpha_src[j]); i = target, j = source.
    e = alpha_dst + alpha_src_row                                     # [N, N]
    e = jnp.where(e > 0, e, NEG_SLOPE * e)
    # Masked softmax over incoming edges (axis=1 = sources), mask applied as a
    # precomputed additive bias (0 on edges, -1e30 off-edges).  Self-loops
    # guarantee every row has >=1 unmasked entry, so masked entries underflow
    # to exactly 0 after exp (no second select needed) and denom > 0.
    e = e + adj_bias
    e_max = jnp.max(e, axis=1, keepdims=True)
    p = jnp.exp(e - e_max)
    denom = jnp.sum(p, axis=1, keepdims=True)
    alpha = p * pl.reciprocal(denom, approx=True)                     # EUP
    # Aggregate on the MXU: out = alpha @ h + bias
    out = jnp.dot(alpha.astype(jnp.bfloat16), h.astype(jnp.bfloat16),
                  preferred_element_type=jnp.float32)
    return out + b


def _gat_fused_kernel(x_ref, adjb_ref, colb_ref,
                      w1_ref, as1_ref, ad1_ref, b1_ref,
                      w2_ref, as2_ref, ad2_ref, b2_ref,
                      w3_ref, as3_ref, ad3_ref, b3_ref,
                      out_ref):
    adj_bias = adjb_ref[...]                      # f32 additive edge mask

    h = _gat_conv(x_ref[...], w1_ref[...], as1_ref[...], ad1_ref[...],
                  b1_ref[...], adj_bias)
    h = jnp.maximum(h, 0.0)                       # ReLU (dropout: eval no-op)
    h = _gat_conv(h, w2_ref[...], as2_ref[...], ad2_ref[...], b2_ref[...],
                  adj_bias)
    h = jnp.maximum(h, 0.0)                       # ReLU (dropout: eval no-op)
    h = _gat_conv(h, w3_ref[...], as3_ref[...], ad3_ref[...], b3_ref[...],
                  adj_bias)

    # LogSoftmax over the real output channels only; columns >= out_channels
    # get -1e30 via the precomputed column bias and are sliced off on the host.
    # Output store is lane-dense (128-wide padded slab).
    z = h + colb_ref[...]
    z = z - jnp.max(z, axis=1, keepdims=True)
    out_ref[...] = z - jnp.log(jnp.sum(jnp.exp(z), axis=1, keepdims=True))


def _prepare_params(params):
    """Zero-pad every feature dim to the lane width; weights to bf16."""
    flat = []
    for w, a_src, a_dst, b in params:
        f_in, f_out = w.shape
        fi, fo = _round_up(f_in, LANE), _round_up(f_out, LANE)
        flat += [_pad_to(w, (fi, fo)).astype(jnp.bfloat16),
                 _pad_to(a_src, (1, fo)),
                 _pad_to(a_dst, (1, fo)),
                 _pad_to(b, (1, fo))]
    return flat


@jax.jit
def gat_forward(x, adj, params):
    """Fused 3-layer GAT forward. x: [N, C] f32, adj: [N, N] int8 mask."""
    n, f_in = x.shape
    out_c = params[-1][0].shape[1]
    f_out_pad = _round_up(out_c, LANE)

    # bf16 lane-padded node features (first-layer matmul operand).
    x_p = _pad_to(x, (n, _round_up(f_in, LANE))).astype(jnp.bfloat16)
    # Additive attention mask: 0 on edges / self-loops, -1e30 elsewhere.
    adj_bias = jnp.where(adj != 0, 0.0, NEG_INF).astype(jnp.float32)
    # Additive column mask for the final LogSoftmax over padded channels.
    col_bias = jnp.where(jnp.arange(f_out_pad)[None, :] < out_c,
                         0.0, NEG_INF).astype(jnp.float32)
    flat_params = _prepare_params(params)

    vmem = pl.BlockSpec(memory_space=pltpu.MemorySpace.VMEM)
    out_padded = pl.pallas_call(
        _gat_fused_kernel,
        out_shape=jax.ShapeDtypeStruct((n, f_out_pad), jnp.float32),
        in_specs=[vmem] * (3 + len(flat_params)),
        out_specs=vmem,
        compiler_params=pltpu.CompilerParams(vmem_limit_bytes=32 * 1024 * 1024),
    )(x_p, adj_bias, col_bias, *flat_params)
    return out_padded[:, :out_c]


def gat_reference(x, adj, params):
    """Pure-JAX reference mirroring the kernel's bf16-matmul precision."""
    mask = adj != 0
    h = x
    n_layers = len(params)
    for li, (w, a_src, a_dst, b) in enumerate(params):
        hw = jnp.dot(h.astype(jnp.bfloat16), w.astype(jnp.bfloat16),
                     preferred_element_type=jnp.float32)
        a_dst_n = jnp.sum(hw * a_dst, axis=-1, keepdims=True)
        a_src_n = jnp.sum(hw * a_src, axis=-1, keepdims=True)
        e = a_dst_n + a_src_n.T
        e = jnp.where(e > 0, e, NEG_SLOPE * e)
        e = jnp.where(mask, e, NEG_INF)
        p = jnp.exp(e - jnp.max(e, axis=1, keepdims=True))
        alpha = p / jnp.sum(p, axis=1, keepdims=True)
        out = jnp.dot(alpha.astype(jnp.bfloat16), hw.astype(jnp.bfloat16),
                      preferred_element_type=jnp.float32) + b
        h = jnp.maximum(out, 0.0) if li < n_layers - 1 else out
    return jax.nn.log_softmax(h, axis=1)


def init_gat_params(key, f_in, f_out):
    """Deterministic glorot-uniform weights (shapes per PyG GATConv, heads=1)."""
    k1, k2, k3 = jax.random.split(key, 3)
    scale = (6.0 / (f_in + f_out)) ** 0.5
    w = jax.random.uniform(k1, (f_in, f_out), jnp.float32, -scale, scale)
    a_src = jax.random.uniform(k2, (1, f_out), jnp.float32, -scale, scale)
    a_dst = jax.random.uniform(k3, (1, f_out), jnp.float32, -scale, scale)
    b = jnp.zeros((1, f_out), jnp.float32)
    return w, a_src, a_dst, b


if __name__ == "__main__":
    N = 16
    IN_C, H1, H2, OUT_C = 55, 32, 16, 2

    key = jax.random.PRNGKey(0)
    kx, k1, k2, k3 = jax.random.split(key, 4)

    # Node features (data.x)
    x = jax.random.normal(kx, (N, IN_C), dtype=jnp.float32)

    # Deterministic edge_index (data.edge_index): ring + skip-3, both directions.
    src, dst = [], []
    for i in range(N):
        for d in (1, 3):
            src += [i, (i + d) % N]
            dst += [(i + d) % N, i]
    edge_index = jnp.array([src, dst], dtype=jnp.int32)      # [2, 64]

    # Dense int8 adjacency mask adj[dst, src] = 1, plus self-loops (GATConv default).
    adj = jnp.zeros((N, N), jnp.int32)
    adj = adj.at[edge_index[1], edge_index[0]].set(1)
    adj = jnp.maximum(adj, jnp.eye(N, dtype=jnp.int32)).astype(jnp.int8)

    params = (
        init_gat_params(k1, IN_C, H1),
        init_gat_params(k2, H1, H2),
        init_gat_params(k3, H2, OUT_C),
    )

    out = jax.block_until_ready(gat_forward(x, adj, params))

    assert out.shape == (N, OUT_C), out.shape
    assert bool(jnp.all(jnp.isfinite(out)))
    # log-softmax rows should sum to ~1 after exp
    assert bool(jnp.allclose(jnp.sum(jnp.exp(out), axis=1), 1.0, atol=1e-4))
    # agrees with a pure-JAX reference using the same bf16 matmul precision
    ref = gat_reference(x, adj, params)
    assert bool(jnp.allclose(out, ref, atol=2e-2, rtol=2e-2)), (
        float(jnp.max(jnp.abs(out - ref))))
    print("KERNEL_OK")
</pallas_src>

<mosaic_0001>
module attributes {stable_mosaic.version = 11 : i64} {
  func.func @_gat_fused_kernel(%arg0: memref<16x128xbf16, #tpu.memory_space<vmem>>, %arg1: memref<16x16xf32, #tpu.memory_space<vmem>>, %arg2: memref<1x128xf32, #tpu.memory_space<vmem>>, %arg3: memref<128x128xbf16, #tpu.memory_space<vmem>>, %arg4: memref<1x128xf32, #tpu.memory_space<vmem>>, %arg5: memref<1x128xf32, #tpu.memory_space<vmem>>, %arg6: memref<1x128xf32, #tpu.memory_space<vmem>>, %arg7: memref<128x128xbf16, #tpu.memory_space<vmem>>, %arg8: memref<1x128xf32, #tpu.memory_space<vmem>>, %arg9: memref<1x128xf32, #tpu.memory_space<vmem>>, %arg10: memref<1x128xf32, #tpu.memory_space<vmem>>, %arg11: memref<128x128xbf16, #tpu.memory_space<vmem>>, %arg12: memref<1x128xf32, #tpu.memory_space<vmem>>, %arg13: memref<1x128xf32, #tpu.memory_space<vmem>>, %arg14: memref<1x128xf32, #tpu.memory_space<vmem>>, %arg15: memref<16x128xf32, #tpu.memory_space<vmem>>) attributes {dimension_semantics = [], scalar_prefetch = 0 : i64, scratch_operands = 0 : i64, tpu.core_type = #tpu.core_type<tc>} {
    %c0 = arith.constant 0 : index
    %c0_0 = arith.constant 0 : index
    %0 = vector.load %arg1[%c0, %c0_0] : memref<16x16xf32, #tpu.memory_space<vmem>>, vector<16x16xf32>
    %c0_1 = arith.constant 0 : index
    %c0_2 = arith.constant 0 : index
    %1 = vector.load %arg0[%c0_1, %c0_2] : memref<16x128xbf16, #tpu.memory_space<vmem>>, vector<16x128xbf16>
    %c0_3 = arith.constant 0 : index
    %c0_4 = arith.constant 0 : index
    %2 = vector.load %arg3[%c0_3, %c0_4] : memref<128x128xbf16, #tpu.memory_space<vmem>>, vector<128x128xbf16>
    %c0_5 = arith.constant 0 : index
    %c0_6 = arith.constant 0 : index
    %3 = vector.load %arg4[%c0_5, %c0_6] : memref<1x128xf32, #tpu.memory_space<vmem>>, vector<1x128xf32>
    %c0_7 = arith.constant 0 : index
    %c0_8 = arith.constant 0 : index
    %4 = vector.load %arg5[%c0_7, %c0_8] : memref<1x128xf32, #tpu.memory_space<vmem>>, vector<1x128xf32>
    %c0_9 = arith.constant 0 : index
    %c0_10 = arith.constant 0 : index
    %5 = vector.load %arg6[%c0_9, %c0_10] : memref<1x128xf32, #tpu.memory_space<vmem>>, vector<1x128xf32>
    %cst = arith.constant dense<0.000000e+00> : vector<16x128xf32>
    %6 = tpu.matmul %1, %2, %cst {dimension_numbers = #tpu.dot_dimension_numbers<[1], [0], [0], [1], [0, 0, 1, 1], [], []>} : vector<16x128xbf16>, vector<128x128xbf16>, vector<16x128xf32> -> vector<16x128xf32>
    %7 = vector.broadcast %4 : vector<1x128xf32> to vector<16x128xf32>
    %8 = arith.mulf %6, %7 : vector<16x128xf32>
    %cst_11 = arith.constant dense<0.000000e+00> : vector<16xf32>
    %9 = vector.multi_reduction <add>, %8, %cst_11 [1] : vector<16x128xf32> to vector<16xf32>
    %10 = vector.shape_cast %9 : vector<16xf32> to vector<16x1xf32>
    %cst_12 = arith.constant dense<0.000000e+00> : vector<1x16xf32>
    %11 = tpu.matmul %3, %6, %cst_12 {dimension_numbers = #tpu.dot_dimension_numbers<[1], [1], [0], [0], [0, 0, 1, 0], [], []>} : vector<1x128xf32>, vector<16x128xf32>, vector<1x16xf32> -> vector<1x16xf32>
    %12 = vector.broadcast %10 : vector<16x1xf32> to vector<16x16xf32>
    %13 = vector.broadcast %11 : vector<1x16xf32> to vector<16x16xf32>
    %14 = arith.addf %12, %13 : vector<16x16xf32>
    %cst_13 = arith.constant 0.000000e+00 : f32
    %15 = vector.broadcast %cst_13 : f32 to vector<16x16xf32>
    %16 = arith.cmpf ogt, %14, %15 : vector<16x16xf32>
    %cst_14 = arith.constant 2.000000e-01 : f32
    %17 = vector.broadcast %cst_14 : f32 to vector<16x16xf32>
    %18 = arith.mulf %17, %14 : vector<16x16xf32>
    %19 = arith.select %16, %14, %18 : vector<16x16xi1>, vector<16x16xf32>
    %20 = arith.addf %19, %0 : vector<16x16xf32>
    %cst_15 = arith.constant dense<0xFF800000> : vector<16xf32>
    %21 = vector.multi_reduction <maximumf>, %20, %cst_15 [1] : vector<16x16xf32> to vector<16xf32>
    %22 = vector.shape_cast %21 : vector<16xf32> to vector<16x1xf32>
    %23 = vector.broadcast %22 : vector<16x1xf32> to vector<16x16xf32>
    %24 = arith.subf %20, %23 : vector<16x16xf32>
    %25 = math.exp %24 : vector<16x16xf32>
    %cst_16 = arith.constant dense<0.000000e+00> : vector<16xf32>
    %26 = vector.multi_reduction <add>, %25, %cst_16 [1] : vector<16x16xf32> to vector<16xf32>
    %27 = vector.shape_cast %26 : vector<16xf32> to vector<16x1xf32>
    %28 = tpu.reciprocal %27 {approx = true} : vector<16x1xf32> -> vector<16x1xf32>
    %29 = vector.broadcast %28 : vector<16x1xf32> to vector<16x16xf32>
    %30 = arith.mulf %25, %29 : vector<16x16xf32>
    %31 = arith.truncf %30 : vector<16x16xf32> to vector<16x16xbf16>
    %32 = arith.truncf %6 : vector<16x128xf32> to vector<16x128xbf16>
    %cst_17 = arith.constant dense<0.000000e+00> : vector<16x128xf32>
    %33 = tpu.matmul %31, %32, %cst_17 {dimension_numbers = #tpu.dot_dimension_numbers<[1], [0], [0], [1], [0, 0, 1, 1], [], []>} : vector<16x16xbf16>, vector<16x128xbf16>, vector<16x128xf32> -> vector<16x128xf32>
    %34 = vector.broadcast %5 : vector<1x128xf32> to vector<16x128xf32>
    %35 = arith.addf %33, %34 : vector<16x128xf32>
    %cst_18 = arith.constant 0.000000e+00 : f32
    %36 = vector.broadcast %cst_18 : f32 to vector<16x128xf32>
    %37 = arith.maximumf %35, %36 : vector<16x128xf32>
    %c0_19 = arith.constant 0 : index
    %c0_20 = arith.constant 0 : index
    %38 = vector.load %arg7[%c0_19, %c0_20] : memref<128x128xbf16, #tpu.memory_space<vmem>>, vector<128x128xbf16>
    %c0_21 = arith.constant 0 : index
    %c0_22 = arith.constant 0 : index
    %39 = vector.load %arg8[%c0_21, %c0_22] : memref<1x128xf32, #tpu.memory_space<vmem>>, vector<1x128xf32>
    %c0_23 = arith.constant 0 : index
    %c0_24 = arith.constant 0 : index
    %40 = vector.load %arg9[%c0_23, %c0_24] : memref<1x128xf32, #tpu.memory_space<vmem>>, vector<1x128xf32>
    %c0_25 = arith.constant 0 : index
    %c0_26 = arith.constant 0 : index
    %41 = vector.load %arg10[%c0_25, %c0_26] : memref<1x128xf32, #tpu.memory_space<vmem>>, vector<1x128xf32>
    %42 = arith.truncf %37 : vector<16x128xf32> to vector<16x128xbf16>
    %cst_27 = arith.constant dense<0.000000e+00> : vector<16x128xf32>
    %43 = tpu.matmul %42, %38, %cst_27 {dimension_numbers = #tpu.dot_dimension_numbers<[1], [0], [0], [1], [0, 0, 1, 1], [], []>} : vector<16x128xbf16>, vector<128x128xbf16>, vector<16x128xf32> -> vector<16x128xf32>
    %44 = vector.broadcast %40 : vector<1x128xf32> to vector<16x128xf32>
    %45 = arith.mulf %43, %44 : vector<16x128xf32>
    %cst_28 = arith.constant dense<0.000000e+00> : vector<16xf32>
    %46 = vector.multi_reduction <add>, %45, %cst_28 [1] : vector<16x128xf32> to vector<16xf32>
    %47 = vector.shape_cast %46 : vector<16xf32> to vector<16x1xf32>
    %cst_29 = arith.constant dense<0.000000e+00> : vector<1x16xf32>
    %48 = tpu.matmul %39, %43, %cst_29 {dimension_numbers = #tpu.dot_dimension_numbers<[1], [1], [0], [0], [0, 0, 1, 0], [], []>} : vector<1x128xf32>, vector<16x128xf32>, vector<1x16xf32> -> vector<1x16xf32>
    %49 = vector.broadcast %47 : vector<16x1xf32> to vector<16x16xf32>
    %50 = vector.broadcast %48 : vector<1x16xf32> to vector<16x16xf32>
    %51 = arith.addf %49, %50 : vector<16x16xf32>
    %cst_30 = arith.constant 0.000000e+00 : f32
    %52 = vector.broadcast %cst_30 : f32 to vector<16x16xf32>
    %53 = arith.cmpf ogt, %51, %52 : vector<16x16xf32>
    %cst_31 = arith.constant 2.000000e-01 : f32
    %54 = vector.broadcast %cst_31 : f32 to vector<16x16xf32>
    %55 = arith.mulf %54, %51 : vector<16x16xf32>
    %56 = arith.select %53, %51, %55 : vector<16x16xi1>, vector<16x16xf32>
    %57 = arith.addf %56, %0 : vector<16x16xf32>
    %cst_32 = arith.constant dense<0xFF800000> : vector<16xf32>
    %58 = vector.multi_reduction <maximumf>, %57, %cst_32 [1] : vector<16x16xf32> to vector<16xf32>
    %59 = vector.shape_cast %58 : vector<16xf32> to vector<16x1xf32>
    %60 = vector.broadcast %59 : vector<16x1xf32> to vector<16x16xf32>
    %61 = arith.subf %57, %60 : vector<16x16xf32>
    %62 = math.exp %61 : vector<16x16xf32>
    %cst_33 = arith.constant dense<0.000000e+00> : vector<16xf32>
    %63 = vector.multi_reduction <add>, %62, %cst_33 [1] : vector<16x16xf32> to vector<16xf32>
    %64 = vector.shape_cast %63 : vector<16xf32> to vector<16x1xf32>
    %65 = tpu.reciprocal %64 {approx = true} : vector<16x1xf32> -> vector<16x1xf32>
    %66 = vector.broadcast %65 : vector<16x1xf32> to vector<16x16xf32>
    %67 = arith.mulf %62, %66 : vector<16x16xf32>
    %68 = arith.truncf %67 : vector<16x16xf32> to vector<16x16xbf16>
    %69 = arith.truncf %43 : vector<16x128xf32> to vector<16x128xbf16>
    %cst_34 = arith.constant dense<0.000000e+00> : vector<16x128xf32>
    %70 = tpu.matmul %68, %69, %cst_34 {dimension_numbers = #tpu.dot_dimension_numbers<[1], [0], [0], [1], [0, 0, 1, 1], [], []>} : vector<16x16xbf16>, vector<16x128xbf16>, vector<16x128xf32> -> vector<16x128xf32>
    %71 = vector.broadcast %41 : vector<1x128xf32> to vector<16x128xf32>
    %72 = arith.addf %70, %71 : vector<16x128xf32>
    %cst_35 = arith.constant 0.000000e+00 : f32
    %73 = vector.broadcast %cst_35 : f32 to vector<16x128xf32>
    %74 = arith.maximumf %72, %73 : vector<16x128xf32>
    %c0_36 = arith.constant 0 : index
    %c0_37 = arith.constant 0 : index
    %75 = vector.load %arg11[%c0_36, %c0_37] : memref<128x128xbf16, #tpu.memory_space<vmem>>, vector<128x128xbf16>
    %c0_38 = arith.constant 0 : index
    %c0_39 = arith.constant 0 : index
    %76 = vector.load %arg12[%c0_38, %c0_39] : memref<1x128xf32, #tpu.memory_space<vmem>>, vector<1x128xf32>
    %c0_40 = arith.constant 0 : index
    %c0_41 = arith.constant 0 : index
    %77 = vector.load %arg13[%c0_40, %c0_41] : memref<1x128xf32, #tpu.memory_space<vmem>>, vector<1x128xf32>
    %c0_42 = arith.constant 0 : index
    %c0_43 = arith.constant 0 : index
    %78 = vector.load %arg14[%c0_42, %c0_43] : memref<1x128xf32, #tpu.memory_space<vmem>>, vector<1x128xf32>
    %79 = arith.truncf %74 : vector<16x128xf32> to vector<16x128xbf16>
    %cst_44 = arith.constant dense<0.000000e+00> : vector<16x128xf32>
    %80 = tpu.matmul %79, %75, %cst_44 {dimension_numbers = #tpu.dot_dimension_numbers<[1], [0], [0], [1], [0, 0, 1, 1], [], []>} : vector<16x128xbf16>, vector<128x128xbf16>, vector<16x128xf32> -> vector<16x128xf32>
    %81 = vector.broadcast %77 : vector<1x128xf32> to vector<16x128xf32>
    %82 = arith.mulf %80, %81 : vector<16x128xf32>
    %cst_45 = arith.constant dense<0.000000e+00> : vector<16xf32>
    %83 = vector.multi_reduction <add>, %82, %cst_45 [1] : vector<16x128xf32> to vector<16xf32>
    %84 = vector.shape_cast %83 : vector<16xf32> to vector<16x1xf32>
    %cst_46 = arith.constant dense<0.000000e+00> : vector<1x16xf32>
    %85 = tpu.matmul %76, %80, %cst_46 {dimension_numbers = #tpu.dot_dimension_numbers<[1], [1], [0], [0], [0, 0, 1, 0], [], []>} : vector<1x128xf32>, vector<16x128xf32>, vector<1x16xf32> -> vector<1x16xf32>
    %86 = vector.broadcast %84 : vector<16x1xf32> to vector<16x16xf32>
    %87 = vector.broadcast %85 : vector<1x16xf32> to vector<16x16xf32>
    %88 = arith.addf %86, %87 : vector<16x16xf32>
    %cst_47 = arith.constant 0.000000e+00 : f32
    %89 = vector.broadcast %cst_47 : f32 to vector<16x16xf32>
    %90 = arith.cmpf ogt, %88, %89 : vector<16x16xf32>
    %cst_48 = arith.constant 2.000000e-01 : f32
    %91 = vector.broadcast %cst_48 : f32 to vector<16x16xf32>
    %92 = arith.mulf %91, %88 : vector<16x16xf32>
    %93 = arith.select %90, %88, %92 : vector<16x16xi1>, vector<16x16xf32>
    %94 = arith.addf %93, %0 : vector<16x16xf32>
    %cst_49 = arith.constant dense<0xFF800000> : vector<16xf32>
    %95 = vector.multi_reduction <maximumf>, %94, %cst_49 [1] : vector<16x16xf32> to vector<16xf32>
    %96 = vector.shape_cast %95 : vector<16xf32> to vector<16x1xf32>
    %97 = vector.broadcast %96 : vector<16x1xf32> to vector<16x16xf32>
    %98 = arith.subf %94, %97 : vector<16x16xf32>
    %99 = math.exp %98 : vector<16x16xf32>
    %cst_50 = arith.constant dense<0.000000e+00> : vector<16xf32>
    %100 = vector.multi_reduction <add>, %99, %cst_50 [1] : vector<16x16xf32> to vector<16xf32>
    %101 = vector.shape_cast %100 : vector<16xf32> to vector<16x1xf32>
    %102 = tpu.reciprocal %101 {approx = true} : vector<16x1xf32> -> vector<16x1xf32>
    %103 = vector.broadcast %102 : vector<16x1xf32> to vector<16x16xf32>
    %104 = arith.mulf %99, %103 : vector<16x16xf32>
    %105 = arith.truncf %104 : vector<16x16xf32> to vector<16x16xbf16>
    %106 = arith.truncf %80 : vector<16x128xf32> to vector<16x128xbf16>
    %cst_51 = arith.constant dense<0.000000e+00> : vector<16x128xf32>
    %107 = tpu.matmul %105, %106, %cst_51 {dimension_numbers = #tpu.dot_dimension_numbers<[1], [0], [0], [1], [0, 0, 1, 1], [], []>} : vector<16x16xbf16>, vector<16x128xbf16>, vector<16x128xf32> -> vector<16x128xf32>
    %108 = vector.broadcast %78 : vector<1x128xf32> to vector<16x128xf32>
    %109 = arith.addf %107, %108 : vector<16x128xf32>
    %c0_52 = arith.constant 0 : index
    %c0_53 = arith.constant 0 : index
    %110 = vector.load %arg2[%c0_52, %c0_53] : memref<1x128xf32, #tpu.memory_space<vmem>>, vector<1x128xf32>
    %111 = vector.broadcast %110 : vector<1x128xf32> to vector<16x128xf32>
    %112 = arith.addf %109, %111 : vector<16x128xf32>
    %cst_54 = arith.constant dense<0xFF800000> : vector<16xf32>
    %113 = vector.multi_reduction <maximumf>, %112, %cst_54 [1] : vector<16x128xf32> to vector<16xf32>
    %114 = vector.shape_cast %113 : vector<16xf32> to vector<16x1xf32>
    %115 = vector.broadcast %114 : vector<16x1xf32> to vector<16x128xf32>
    %116 = arith.subf %112, %115 : vector<16x128xf32>
    %117 = math.exp %116 : vector<16x128xf32>
    %cst_55 = arith.constant dense<0.000000e+00> : vector<16xf32>
    %118 = vector.multi_reduction <add>, %117, %cst_55 [1] : vector<16x128xf32> to vector<16xf32>
    %119 = vector.shape_cast %118 : vector<16xf32> to vector<16x1xf32>
    %120 = math.log %119 : vector<16x1xf32>
    %121 = vector.broadcast %120 : vector<16x1xf32> to vector<16x128xf32>
    %122 = arith.subf %116, %121 : vector<16x128xf32>
    %c0_56 = arith.constant 0 : index
    %c0_57 = arith.constant 0 : index
    %123 = vector.load %arg15[%c0_56, %c0_57] : memref<16x128xf32, #tpu.memory_space<vmem>>, vector<16x128xf32>
    tpu.vector_store %arg15[%c0_56, %c0_57], %122 {strides = array<i32>} : memref<16x128xf32, #tpu.memory_space<vmem>>, vector<16x128xf32>,
    return
  }
}

</mosaic_0001>

<bundles_post_ra>
// kernel: gat_forward.1
= control target key start
LH: loop header
LB: loop body
LE: loop exit
PB: predicated region body
PF: predicated region fallthrough
CT: control target
= control target key end

     0   :  { %vm182_vm1 = vcmask 130048   ;;  %s984_s3 = inlined_call_operand.vmem [shape: bf16[128,128], index: 3, kind: input, shape index: {}]   ;;  %s985_s0 = inlined_call_operand.vmem [shape: bf16[16,128], index: 0, kind: input, shape index: {}]   ;;  %s986_s5 = inlined_call_operand.vmem [shape: f32[1,128], index: 5, kind: input, shape index: {}]   ;;  %s987_s4 = inlined_call_operand.vmem [shape: f32[1,128], index: 4, kind: input, shape index: {}]   ;;  %s988_s1 = inlined_call_operand.vmem [shape: f32[16,16], index: 1, kind: input, shape index: {}]   ;;  %s989_s6 = inlined_call_operand.vmem [shape: f32[1,128], index: 6, kind: input, shape index: {}]   ;;  %s990_s7 = inlined_call_operand.vmem [shape: bf16[128,128], index: 7, kind: input, shape index: {}]   ;;  %s991_s9 = inlined_call_operand.vmem [shape: f32[1,128], index: 9, kind: input, shape index: {}]   ;;  %s992_s8 = inlined_call_operand.vmem [shape: f32[1,128], index: 8, kind: input, shape index: {}]   ;;  %s993_s10 = inlined_call_operand.vmem [shape: f32[1,128], index: 10, kind: input, shape index: {}]   ;;  %s994_s11 = inlined_call_operand.vmem [shape: bf16[128,128], index: 11, kind: input, shape index: {}]   ;;  %s995_s13 = inlined_call_operand.vmem [shape: f32[1,128], index: 13, kind: input, shape index: {}]   ;;  %s996_s12 = inlined_call_operand.vmem [shape: f32[1,128], index: 12, kind: input, shape index: {}]   ;;  %s997_s14 = inlined_call_operand.vmem [shape: f32[1,128], index: 14, kind: input, shape index: {}]   ;;  %s998_s2 = inlined_call_operand.vmem [shape: f32[1,128], index: 2, kind: input, shape index: {}]   ;;  %s999_s15 = inlined_call_operand.vmem [shape: f32[16,128], index: 15, kind: output, shape index: {}]  }
   0x1   :  { %v706_v0 = vld [vmem:[%s984_s3 + $0x38] sm:$0xff]  ;;  %v705_v1 = vld [vmem:[%s984_s3 + $0x30] sm:$0xff]  ;;  %v704_v2 = vld [vmem:[%s984_s3 + $0x28] sm:$0xff] }
   0x2   :  { %128 = vmatpush.bf16.msra.mxu0 %v706_v0  ;;  %v703_v3 = vld [vmem:[%s984_s3 + $0x20] sm:$0xff]  ;;  %v702_v4 = vld [vmem:[%s984_s3 + $0x18] sm:$0xff]  ;;  %v701_v5 = vld [vmem:[%s984_s3 + $0x10] sm:$0xff] }
   0x3   :  { %v700_v6 = vld [vmem:[%s984_s3 + $0x8] sm:$0xff]  ;;  %v699_v7 = vld [vmem:[%s984_s3] sm:$0xff]  ;;  %v714_v42 = vld [vmem:[%s990_s7 + $0x38] sm:$0xff] }
   0x4   :  { %v698_v8 = vld [vmem:[%s985_s0] sm:$0xff]  ;;  %v885_v28 = vld [vmem:[%s988_s1 + $0x8] sm:$0xff]  ;;  %v713_v43 = vld [vmem:[%s990_s7 + $0x30] sm:$0xff] }
   0x5   :  { %v723_v9 = vld [vmem:[%s986_s5] ss:$0 sm:$0xff]  ;;  %v712_v44 = vld [vmem:[%s990_s7 + $0x28] sm:$0xff]  ;;  %v710_v53 = vld [vmem:[%s990_s7 + $0x18] sm:$0xff] }
   0x6   :  { %129 = vmatpush.bf16.msra.mxu0 %v705_v1  ;;  %v71_v15 = vld [vmem:[%s987_s4] sm:$0x1]  ;;  %v709_v54 = vld [vmem:[%s990_s7 + $0x10] sm:$0xff]  ;;  %v708_v55 = vld [vmem:[%s990_s7 + $0x8] sm:$0xff] }
   0x7   :  { %v878_v23 = vld [vmem:[%s988_s1] sm:$0xff] }
   0x8   :  { %v711_v45 = vld [vmem:[%s990_s7 + $0x20] sm:$0xff] }
   0x9   :  { %v707_v56 = vld [vmem:[%s990_s7] sm:$0xff] }
   0xa   :  { %130 = vmatpush.bf16.msra.mxu0 %v704_v2  ;;  %v724_v58 = vld [vmem:[%s989_s6] ss:$0 sm:$0xff] }
   0xb   :  { %v725_v1 = vld [vmem:[%s991_s9] ss:$0 sm:$0xff] }
   0xe   :  { %131 = vmatpush.bf16.msra.mxu0 %v703_v3 }
  0x12   :  { %132 = vmatpush.bf16.msra.mxu0 %v702_v4 }
  0x16   :  { %133 = vmatpush.bf16.msra.mxu0 %v701_v5 }
  0x1a   :  { %134 = vmatpush.bf16.msra.mxu0 %v700_v6 }
  0x1e   :  { %135 = vmatpush.bf16.msra.mxu0 %v699_v7  ;;  %v245_v7 = vld [vmem:[%s992_s8] sm:$0x1] }
  0x21   :  { %136 = vmatmul.bf16.vlgmr.msra.gmra.mxu0 %v698_v8 }
  0x9e   :  { %v137_v10 = vpop.f32.mrf.mxu0 }
  0x9f   :  { %v145_v11 = vmul.f32 %v723_v9, %v137_v10 }
  0xa1   :  { %147 = vadd.xlane.f32.xlu0 %v145_v11 }
  0xa6   :  { %v139_v12 = vpop.f32.mrf.mxu0 }
  0xa7   :  { %165 = vmatpush.xpose.msrb.mxu0 %v139_v12  ;;  %v206_v13 = vpack.c.bf16 %v139_v12, %v137_v10  ;;  %v146_v14 = vmul.f32 %v723_v9, %v139_v12 }
  0xa9   :  { %220 = vmatpush.bf16.msra.mxu3 %v206_v13  ;;  %149 = vadd.xlane.f32.xlu0 %v146_v14 }
  0xab   :  { %166 = vmatpush.xpose.msrb.mxu0 %v137_v10 }
  0xad   :  { %297 = vmatpush.bf16.msrb.mxu3 %v714_v42 }
  0xae   :  { %167 = vmatmul.f32.vlgmr.msrb.gmra.mxu0 %v71_v15 }
  0xb1   :  { %298 = vmatpush.bf16.msrb.mxu3 %v713_v43 }
  0xb5   :  { %299 = vmatpush.bf16.msrb.mxu3 %v712_v44 }
  0xb9   :  { %300 = vmatpush.bf16.msrb.mxu3 %v711_v45  ;;  %v718_v45 = vld [vmem:[%s994_s11 + $0x18] sm:$0xff] }
  0xbd   :  { %301 = vmatpush.bf16.msrb.mxu3 %v710_v53 }
  0xc1   :  { %302 = vmatpush.bf16.msrb.mxu3 %v709_v54 }
  0xc5   :  { %303 = vmatpush.bf16.msrb.mxu3 %v708_v55 }
  0xc9   :  { %304 = vmatpush.bf16.msrb.mxu3 %v707_v56 }
 0x114   :  { %v148_v16 = vpop.xlane.xlu0 %147 }
 0x11c   :  { %v150_v19 = vpop.xlane.xlu0 %149 }
 0x12b   :  { %v168_v17 = vpop.f32.mrf.mxu0 }
 0x12c   :  { %v171_v18 = vperm.slane %v168_v17, 0 }
 0x12e   :  { %v172_v20 = vadd.f32 %v171_v18, %v148_v16  ;;  %v173_v21 = vadd.f32 %v171_v18, %v150_v19 }
 0x130   :  { %v176_v22 = vmul.f32 0.2, %v172_v20  ;;  %vm174_vm0 = vcmp.gt.f32.partialorder %v172_v20, 0.0  ;;  %v177_v24 = vmul.f32 0.2, %v173_v21  ;;  %vm175_vm2 = vcmp.gt.f32.partialorder %v173_v21, 0.0 }
 0x132   :  { %v178_v25 = vsel %vm174_vm0, %v172_v20, %v176_v22  ;;  %v179_v29 = vsel %vm175_vm2, %v173_v21, %v177_v24 }
 0x133   :  { %v180_v26 = vadd.f32 %v178_v25, %v878_v23  ;;  %v181_v30 = vadd.f32 %v179_v29, %v885_v28 }
 0x135   :  { %v183_v27 = vsel %vm182_vm1, %v180_v26, -inf  ;;  %v186_v31 = vsel %vm182_vm1, %v181_v30, -inf }
 0x136   :  { %184 = vmax.xlane.f32.xlu1 %v183_v27 }
 0x13e   :  { %187 = vmax.xlane.f32.xlu1 %v186_v31 }
 0x1a9   :  { %v185_v32 = vpop.xlane.xlu1 %184 }
 0x1aa   :  { %v189_v33 = vsub.f32 %v180_v26, %v185_v32 }
 0x1ac   :  { %v191_v34 = vmul.f32 1.442695, %v189_v33 }
 0x1ae   :  { %730 = vpow2.f32 %v191_v34  ;;  %v722_v34 = vld [vmem:[%s994_s11 + $0x38] sm:$0xff] }
 0x1b1   :  { %v188_v35 = vpop.xlane.xlu1 %187 }
 0x1b2   :  { %v190_v36 = vsub.f32 %v181_v30, %v188_v35  ;;  %v721_v35 = vld [vmem:[%s994_s11 + $0x30] sm:$0xff] }
 0x1b4   :  { %v731_v37 = vpop.eup %730  ;;  %v193_v38 = vmul.f32 1.442695, %v190_v36  ;;  %v720_v36 = vld [vmem:[%s994_s11 + $0x28] sm:$0xff] }
 0x1b5   :  { %v195_v39 = vsel %vm182_vm1, %v731_v37, 0.0 }
 0x1b6   :  { %732 = vpow2.f32 %v193_v38  ;;  %196 = vadd.xlane.f32.xlu2 %v195_v39 }
 0x1bc   :  { %v733_v40 = vpop.eup %732 }
 0x1bd   :  { %v198_v41 = vsel %vm182_vm1, %v733_v40, 0.0 }
 0x1be   :  { %199 = vadd.xlane.f32.xlu2 %v198_v41 }
 0x229   :  { %v197_v46 = vpop.xlane.xlu2 %196 }
 0x22a   :  { %734 = vrcp.f32 %v197_v46  ;;  %v717_v46 = vld [vmem:[%s994_s11 + $0x10] sm:$0xff] }
 0x230   :  { %v735_v48 = vpop.eup %734 }
 0x231   :  { %v200_v47 = vpop.xlane.xlu2 %199  ;;  %v203_v50 = vmul.f32 %v735_v48, %v731_v37  ;;  %v719_v37 = vld [vmem:[%s994_s11 + $0x20] sm:$0xff] }
 0x232   :  { %736 = vrcp.f32 %v200_v47  ;;  %v716_v47 = vld [vmem:[%s994_s11 + $0x8] sm:$0xff]  ;;  %v715_v48 = vld [vmem:[%s994_s11] sm:$0xff] }
 0x238   :  { %v737_v49 = vpop.eup %736 }
 0x239   :  { %v204_v51 = vmul.f32 %v737_v49, %v733_v40 }
 0x23b   :  { %v205_v52 = vpack.c.bf16 %v204_v51, %v203_v50  ;;  %v726_v50 = vld [vmem:[%s993_s10] ss:$0 sm:$0xff] }
 0x23d   :  { %631 = vmatmul.msk.bf16.vlgmr.msra.gmra.mxu3 %vm182_vm1, %v205_v52 }
 0x2c0   :  { %v222_v57 = vpop.f32.mrf.mxu3 }
 0x2c1   :  { %v223_v59 = vadd.f32 %v724_v58, %v222_v57  ;;  %v727_v57 = vld [vmem:[%s995_s13] ss:$0 sm:$0xff] }
 0x2c3   :  { %v227_v62 = vmax.f32 %v223_v59, 0.0 }
 0x2c8   :  { %v224_v60 = vpop.f32.mrf.mxu3 }
 0x2c9   :  { %v225_v61 = vadd.f32 %v724_v58, %v224_v60 }
 0x2cb   :  { %v228_v63 = vmax.f32 %v225_v61, 0.0 }
 0x2cd   :  { %v248_v0 = vpack.c.bf16 %v228_v63, %v227_v62  ;;  %v413_v63 = vld [vmem:[%s996_s12] sm:$0x1] }
 0x2cf   :  { %305 = vmatmul.bf16.vlgmr.msrb.gmra.mxu3 %v248_v0 }
 0x352   :  { %v306_v2 = vpop.f32.mrf.mxu3 }
 0x353   :  { %v314_v3 = vmul.f32 %v725_v1, %v306_v2 }
 0x355   :  { %316 = vadd.xlane.f32.xlu0 %v314_v3 }
 0x35a   :  { %v308_v4 = vpop.f32.mrf.mxu3 }
 0x35b   :  { %334 = vmatpush.xpose.msra.mxu1 %v308_v4  ;;  %v374_v5 = vpack.c.bf16 %v308_v4, %v306_v2  ;;  %v315_v6 = vmul.f32 %v725_v1, %v308_v4 }
 0x35d   :  { %388 = vmatpush.bf16.msra.mxu2 %v374_v5  ;;  %318 = vadd.xlane.f32.xlu1 %v315_v6 }
 0x35f   :  { %335 = vmatpush.xpose.msra.mxu1 %v306_v2 }
 0x362   :  { %336 = vmatmul.f32.vlgmr.msra.gmra.mxu1 %v245_v7 }
 0x363   :  { %465 = vmatpush.bf16.msrb.mxu1 %v722_v34 }
 0x367   :  { %466 = vmatpush.bf16.msrb.mxu1 %v721_v35 }
 0x36b   :  { %467 = vmatpush.bf16.msrb.mxu1 %v720_v36 }
 0x36f   :  { %468 = vmatpush.bf16.msrb.mxu1 %v719_v37 }
 0x373   :  { %469 = vmatpush.bf16.msrb.mxu1 %v718_v45 }
 0x377   :  { %470 = vmatpush.bf16.msrb.mxu1 %v717_v46 }
 0x37b   :  { %471 = vmatpush.bf16.msrb.mxu1 %v716_v47 }
 0x37f   :  { %472 = vmatpush.bf16.msrb.mxu1 %v715_v48 }
 0x3c8   :  { %v317_v10 = vpop.xlane.xlu0 %316 }
 0x3d0   :  { %v319_v11 = vpop.xlane.xlu1 %318 }
 0x3df   :  { %v337_v8 = vpop.f32.mrf.mxu1 }
 0x3e0   :  { %v340_v9 = vperm.slane %v337_v8, 0 }
 0x3e2   :  { %v341_v12 = vadd.f32 %v340_v9, %v317_v10  ;;  %v342_v13 = vadd.f32 %v340_v9, %v319_v11 }
 0x3e4   :  { %v345_v14 = vmul.f32 0.2, %v341_v12  ;;  %v346_v15 = vmul.f32 0.2, %v342_v13  ;;  %vm343_vm3 = vcmp.gt.f32.partialorder %v341_v12, 0.0  ;;  %vm344_vm4 = vcmp.gt.f32.partialorder %v342_v13, 0.0 }
 0x3e6   :  { %v347_v16 = vsel %vm343_vm3, %v341_v12, %v345_v14  ;;  %v348_v17 = vsel %vm344_vm4, %v342_v13, %v346_v15 }
 0x3e7   :  { %v349_v18 = vadd.f32 %v347_v16, %v878_v23  ;;  %v350_v19 = vadd.f32 %v348_v17, %v885_v28 }
 0x3e9   :  { %v351_v20 = vsel %vm182_vm1, %v349_v18, -inf  ;;  %v354_v21 = vsel %vm182_vm1, %v350_v19, -inf }
 0x3ea   :  { %352 = vmax.xlane.f32.xlu2 %v351_v20  ;;  %355 = vmax.xlane.f32.xlu0 %v354_v21 }
 0x45d   :  { %v353_v22 = vpop.xlane.xlu2 %352  ;;  %v356_v24 = vpop.xlane.xlu0 %355 }
 0x45e   :  { %v357_v25 = vsub.f32 %v349_v18, %v353_v22  ;;  %v358_v26 = vsub.f32 %v350_v19, %v356_v24 }
 0x460   :  { %v359_v27 = vmul.f32 1.442695, %v357_v25  ;;  %v361_v29 = vmul.f32 1.442695, %v358_v26 }
 0x462   :  { %738 = vpow2.f32 %v359_v27 }
 0x463   :  { %740 = vpow2.f32 %v361_v29 }
 0x468   :  { %v739_v30 = vpop.eup %738 }
 0x469   :  { %v741_v31 = vpop.eup %740  ;;  %v363_v32 = vsel %vm182_vm1, %v739_v30, 0.0 }
 0x46a   :  { %364 = vadd.xlane.f32.xlu1 %v363_v32  ;;  %v366_v33 = vsel %vm182_vm1, %v741_v31, 0.0  ;;  %v729_v32 = vld [vmem:[%s998_s2] ss:$0 sm:$0xff] }
 0x46b   :  { %367 = vadd.xlane.f32.xlu2 %v366_v33 }
 0x4dd   :  { %v365_v38 = vpop.xlane.xlu1 %364 }
 0x4de   :  { %v368_v39 = vpop.xlane.xlu2 %367  ;;  %742 = vrcp.f32 %v365_v38 }
 0x4df   :  { %744 = vrcp.f32 %v368_v39 }
 0x4e4   :  { %v743_v40 = vpop.eup %742 }
 0x4e5   :  { %v745_v41 = vpop.eup %744  ;;  %v371_v42 = vmul.f32 %v743_v40, %v739_v30 }
 0x4e6   :  { %v372_v43 = vmul.f32 %v745_v41, %v741_v31  ;;  %v728_v31 = vld [vmem:[%s997_s14] ss:$0 sm:$0xff] }
 0x4e8   :  { %v373_v44 = vpack.c.bf16 %v372_v43, %v371_v42 }
 0x4ea   :  { %664 = vmatmul.msk.bf16.vlgmr.msra.gmra.mxu2 %vm182_vm1, %v373_v44 }
 0x56d   :  { %v390_v49 = vpop.f32.mrf.mxu2 }
 0x56e   :  { %v391_v51 = vadd.f32 %v726_v50, %v390_v49 }
 0x570   :  { %v395_v54 = vmax.f32 %v391_v51, 0.0 }
 0x575   :  { %v392_v52 = vpop.f32.mrf.mxu2 }
 0x576   :  { %v393_v53 = vadd.f32 %v726_v50, %v392_v52 }
 0x578   :  { %v396_v55 = vmax.f32 %v393_v53, 0.0 }
 0x57a   :  { %v416_v56 = vpack.c.bf16 %v396_v55, %v395_v54 }
 0x57c   :  { %473 = vmatmul.bf16.vlgmr.msrb.gmra.mxu1 %v416_v56 }
 0x5f9   :  { %v474_v58 = vpop.f32.mrf.mxu1 }
 0x5fa   :  { %v482_v59 = vmul.f32 %v727_v57, %v474_v58 }
 0x5fc   :  { %484 = vadd.xlane.f32.xlu0 %v482_v59 }
 0x601   :  { %v476_v60 = vpop.f32.mrf.mxu1 }
 0x602   :  { %502 = vmatpush.xpose.msrb.mxu2 %v476_v60  ;;  %v483_v61 = vmul.f32 %v727_v57, %v476_v60  ;;  %v542_v62 = vpack.c.bf16 %v476_v60, %v474_v58 }
 0x604   :  { %486 = vadd.xlane.f32.xlu1 %v483_v61 }
 0x606   :  { %503 = vmatpush.xpose.msrb.mxu2 %v474_v58 }
 0x609   :  { %504 = vmatmul.f32.vlgmr.msrb.gmra.mxu2 %v413_v63 }
 0x60a   :  { %556 = vmatpush.bf16.msra.mxu2 %v542_v62 }
 0x66f   :  { %v485_v2 = vpop.xlane.xlu0 %484 }
 0x677   :  { %v487_v3 = vpop.xlane.xlu1 %486 }
 0x68c   :  { %v505_v0 = vpop.f32.mrf.mxu2 }
 0x68d   :  { %v508_v1 = vperm.slane %v505_v0, 0 }
 0x68f   :  { %v509_v4 = vadd.f32 %v508_v1, %v485_v2  ;;  %v510_v5 = vadd.f32 %v508_v1, %v487_v3 }
 0x691   :  { %v513_v6 = vmul.f32 0.2, %v509_v4  ;;  %v514_v7 = vmul.f32 0.2, %v510_v5  ;;  %vm511_vm5 = vcmp.gt.f32.partialorder %v509_v4, 0.0  ;;  %vm512_vm6 = vcmp.gt.f32.partialorder %v510_v5, 0.0 }
 0x693   :  { %v515_v8 = vsel %vm511_vm5, %v509_v4, %v513_v6  ;;  %v516_v9 = vsel %vm512_vm6, %v510_v5, %v514_v7 }
 0x694   :  { %v517_v10 = vadd.f32 %v515_v8, %v878_v23  ;;  %v518_v11 = vadd.f32 %v516_v9, %v885_v28 }
 0x696   :  { %v519_v12 = vsel %vm182_vm1, %v517_v10, -inf  ;;  %v522_v13 = vsel %vm182_vm1, %v518_v11, -inf }
 0x697   :  { %520 = vmax.xlane.f32.xlu2 %v519_v12  ;;  %523 = vmax.xlane.f32.xlu0 %v522_v13 }
 0x70a   :  { %v521_v14 = vpop.xlane.xlu2 %520  ;;  %v524_v15 = vpop.xlane.xlu0 %523 }
 0x70b   :  { %v525_v16 = vsub.f32 %v517_v10, %v521_v14  ;;  %v526_v17 = vsub.f32 %v518_v11, %v524_v15 }
 0x70d   :  { %v527_v18 = vmul.f32 1.442695, %v525_v16  ;;  %v529_v19 = vmul.f32 1.442695, %v526_v17 }
 0x70f   :  { %746 = vpow2.f32 %v527_v18 }
 0x710   :  { %748 = vpow2.f32 %v529_v19 }
 0x715   :  { %v747_v20 = vpop.eup %746 }
 0x716   :  { %v749_v21 = vpop.eup %748  ;;  %v531_v23 = vsel %vm182_vm1, %v747_v20, 0.0 }
 0x717   :  { %532 = vadd.xlane.f32.xlu1 %v531_v23  ;;  %v534_v28 = vsel %vm182_vm1, %v749_v21, 0.0 }
 0x718   :  { %535 = vadd.xlane.f32.xlu2 %v534_v28 }
 0x78a   :  { %v533_v22 = vpop.xlane.xlu1 %532 }
 0x78b   :  { %v536_v24 = vpop.xlane.xlu2 %535  ;;  %750 = vrcp.f32 %v533_v22 }
 0x78c   :  { %752 = vrcp.f32 %v536_v24 }
 0x791   :  { %v751_v25 = vpop.eup %750 }
 0x792   :  { %v753_v26 = vpop.eup %752  ;;  %v539_v27 = vmul.f32 %v751_v25, %v747_v20 }
 0x793   :  { %v540_v29 = vmul.f32 %v753_v26, %v749_v21 }
 0x795   :  { %v541_v30 = vpack.c.bf16 %v540_v29, %v539_v27 }
 0x797   :  { %697 = vmatmul.msk.bf16.vlgmr.msra.gmra.mxu2 %vm182_vm1, %v541_v30 }
 0x81a   :  { %v558_v33 = vpop.f32.mrf.mxu2 }
 0x81b   :  { %v559_v34 = vadd.f32 %v728_v31, %v558_v33 }
 0x81d   :  { %v567_v35 = vadd.f32 %v729_v32, %v559_v34 }
 0x81f   :  { %569 = vmax.xlane.f32.xlu0 %v567_v35 }
 0x822   :  { %v560_v36 = vpop.f32.mrf.mxu2 }
 0x823   :  { %v561_v37 = vadd.f32 %v728_v31, %v560_v36 }
 0x825   :  { %v568_v38 = vadd.f32 %v729_v32, %v561_v37 }
 0x827   :  { %571 = vmax.xlane.f32.xlu1 %v568_v38 }
 0x892   :  { %v570_v39 = vpop.xlane.xlu0 %569 }
 0x893   :  { %v573_v40 = vsub.f32 %v567_v35, %v570_v39 }
 0x895   :  { %v575_v41 = vmul.f32 1.442695, %v573_v40 }
 0x897   :  { %754 = vpow2.f32 %v575_v41 }
 0x89a   :  { %v572_v42 = vpop.xlane.xlu1 %571 }
 0x89b   :  { %v574_v43 = vsub.f32 %v568_v38, %v572_v42 }
 0x89d   :  { %v755_v44 = vpop.eup %754  ;;  %v577_v45 = vmul.f32 1.442695, %v574_v43 }
 0x89e   :  { %579 = vadd.xlane.f32.xlu2 %v755_v44 }
 0x89f   :  { %756 = vpow2.f32 %v577_v45 }
 0x8a5   :  { %v757_v46 = vpop.eup %756 }
 0x8a6   :  { %581 = vadd.xlane.f32.xlu0 %v757_v46 }
 0x911   :  { %v580_v47 = vpop.xlane.xlu2 %579 }
 0x912   :  { %758 = vlog2.f32 %v580_v47 }
 0x918   :  { %v759_v48 = vpop.eup %758 }
 0x919   :  { %v584_v49 = vmul.f32 0.6931472, %v759_v48  ;;  %v582_v50 = vpop.xlane.xlu0 %581 }
 0x91a   :  { %760 = vlog2.f32 %v582_v50 }
 0x91b   :  { %v587_v51 = vsub.f32 %v573_v40, %v584_v49 }
 0x91d   :  { %589 = vst [vmem:[%s999_s15] sm:$0xff] %v587_v51 }
 0x920   :  { %v761_v52 = vpop.eup %760 }
 0x921   :  { %v586_v53 = vmul.f32 0.6931472, %v761_v52 }
 0x923   :  { %v588_v54 = vsub.f32 %v574_v43, %v586_v53 }
 0x925   :  { %590 = vst [vmem:[%s999_s15 + $0x8] sm:$0xff] %v588_v54 }

</bundles_post_ra>
